<compile_context>
chip_gen: v7x
topology: tpu7x:2x2x1
jax: 0.10.0
libtpu: 0.0.40
codegen_flags: <defaults>
</compile_context>

<pallas_src>
import functools

import jax
import jax.numpy as jnp
from jax import lax
from jax.experimental import pallas as pl
from jax.experimental.pallas import tpu as pltpu

F32 = jnp.float32
BF16 = jnp.bfloat16
BN_EPS = 1e-5
EMBED_DIM = 2048
NUM_CLASSES = 576
VMEM_LIMIT = 32 * 1024 * 1024  # safe on v7x (64 MiB VMEM/TC) and v5e/v6e (128 MiB)


# ----------------------------------------------------------------------------
# helpers
# ----------------------------------------------------------------------------
def _round_up(x, m):
    return (x + m - 1) // m * m


def _pick_tile(dim, max_tile, quantum):
    """Largest multiple of `quantum` <= max_tile that divides `dim` (dim % quantum == 0)."""
    best = quantum
    t = quantum
    while t <= max_tile and t <= dim:
        if dim % t == 0:
            best = t
        t += quantum
    return best


def _pad_rows(x, target):
    if x.shape[0] == target:
        return x
    cfg = [(0, target - x.shape[0])] + [(0, 0)] * (x.ndim - 1)
    return jnp.pad(x, cfg)


# ----------------------------------------------------------------------------
# Pallas kernels
# ----------------------------------------------------------------------------
@functools.partial(jax.jit, static_argnames=("relu", "out_dtype"))
def matmul_affine(a, w, scale, shift, residual=None, *, relu=False, out_dtype=F32):
    """o = maybe_relu((a @ w) * scale + shift [+ residual]) — tiled, bf16 MXU, f32 acc."""
    M0, K0 = a.shape
    N = w.shape[1]
    has_res = residual is not None

    a = a.astype(BF16)
    w = w.astype(BF16)

    # --- K tiling (pad only if ragged AND too big for one full-dim block) ---
    K = K0
    if K % 128 != 0 and K > 1024:
        Kp = _round_up(K, 128)
        a = jnp.pad(a, ((0, 0), (0, Kp - K)))
        w = jnp.pad(w, ((0, Kp - K), (0, 0)))
        K = Kp
    tk = _pick_tile(K, 512, 128) if K % 128 == 0 else K

    # --- N tiling (conv channel counts are 128-multiples; 64/576 fit one block) ---
    tn = _pick_tile(N, 256, 128) if N % 128 == 0 else N

    # --- M tiling ---
    if M0 <= 256:
        tm, Mp = M0, M0
    else:
        tm = 256
        Mp = _round_up(M0, tm)
    if Mp != M0:
        a = _pad_rows(a, Mp)
        if has_res:
            residual = _pad_rows(residual, Mp)

    grid = (Mp // tm, N // tn, K // tk)

    def kernel(*refs):
        if has_res:
            a_ref, w_ref, s_ref, b_ref, r_ref, o_ref, acc_ref = refs
        else:
            a_ref, w_ref, s_ref, b_ref, o_ref, acc_ref = refs
        kk = pl.program_id(2)

        @pl.when(kk == 0)
        def _():
            acc_ref[...] = jnp.zeros_like(acc_ref)

        acc_ref[...] += jnp.dot(a_ref[...], w_ref[...],
                                preferred_element_type=jnp.float32)

        @pl.when(kk == pl.num_programs(2) - 1)
        def _():
            acc = acc_ref[...] * s_ref[...] + b_ref[...]
            if has_res:
                acc = acc + r_ref[...].astype(jnp.float32)
            if relu:
                acc = jnp.maximum(acc, 0.0)
            o_ref[...] = acc.astype(o_ref.dtype)

    in_specs = [
        pl.BlockSpec((tm, tk), lambda i, j, k: (i, k)),
        pl.BlockSpec((tk, tn), lambda i, j, k: (k, j)),
        pl.BlockSpec((1, tn), lambda i, j, k: (0, j)),
        pl.BlockSpec((1, tn), lambda i, j, k: (0, j)),
    ]
    args = [a, w, scale.reshape(1, N).astype(F32), shift.reshape(1, N).astype(F32)]
    if has_res:
        in_specs.append(pl.BlockSpec((tm, tn), lambda i, j, k: (i, j)))
        args.append(residual)

    out = pl.pallas_call(
        kernel,
        out_shape=jax.ShapeDtypeStruct((Mp, N), out_dtype),
        grid_spec=pltpu.PrefetchScalarGridSpec(
            num_scalar_prefetch=0,
            grid=grid,
            in_specs=in_specs,
            out_specs=pl.BlockSpec((tm, tn), lambda i, j, k: (i, j)),
            scratch_shapes=[pltpu.VMEM((tm, tn), jnp.float32)],
        ),
        compiler_params=pltpu.CompilerParams(
            dimension_semantics=("parallel", "parallel", "arbitrary"),
            vmem_limit_bytes=VMEM_LIMIT,
        ),
    )(*args)
    if Mp != M0:
        out = out[:M0]
    return out


@jax.jit
def ibn_a_relu(x, g_ext, s_ext, b_ext):
    """Fused IBN-a: x [N, HW, C] bf16; first-half channels instance-norm, second-half
    folded BatchNorm, then relu — one kernel via per-channel extended params:
        y = (x - mean) * rsqrt(var + eps) * g_ext + x * s_ext + b_ext
    where g_ext is zero on the BN half and s_ext is zero on the IN half."""
    N, HW, C = x.shape

    def kernel(x_ref, g_ref, s_ref, b_ref, o_ref):
        xf = x_ref[...].astype(jnp.float32)
        mean = jnp.mean(xf, axis=1, keepdims=True)
        var = jnp.mean(jnp.square(xf - mean), axis=1, keepdims=True)
        inv = lax.rsqrt(var + BN_EPS)
        y = (xf - mean) * inv * g_ref[...] + xf * s_ref[...] + b_ref[...]
        o_ref[...] = jnp.maximum(y, 0.0).astype(o_ref.dtype)

    return pl.pallas_call(
        kernel,
        out_shape=jax.ShapeDtypeStruct((N, HW, C), x.dtype),
        grid=(N,),
        in_specs=[
            pl.BlockSpec((1, HW, C), lambda n: (n, 0, 0)),
            pl.BlockSpec((1, C), lambda n: (0, 0)),
            pl.BlockSpec((1, C), lambda n: (0, 0)),
            pl.BlockSpec((1, C), lambda n: (0, 0)),
        ],
        out_specs=pl.BlockSpec((1, HW, C), lambda n: (n, 0, 0)),
        compiler_params=pltpu.CompilerParams(
            dimension_semantics=("parallel",),
            vmem_limit_bytes=VMEM_LIMIT,
        ),
    )(x, g_ext, s_ext, b_ext)


@jax.jit
def maxpool_3x3_s2(x):
    """MaxPool2d(kernel=3, stride=2, padding=1) in NHWC; 9 strided slabs max-reduced
    inside a gridded Pallas kernel (no stacked [9, M, C] tensor)."""
    N, H, W, C = x.shape
    Ho = (H + 2 - 3) // 2 + 1
    Wo = (W + 2 - 3) // 2 + 1
    neg = float(jnp.finfo(x.dtype).min)  # dtype-correct (bf16-safe) pad value
    xp = jnp.pad(x, ((0, 0), (1, 1), (1, 1), (0, 0)), constant_values=neg)
    M = N * Ho * Wo
    slabs = []
    for kh in range(3):
        for kw in range(3):
            sl = lax.slice(
                xp,
                (0, kh, kw, 0),
                (N, kh + (Ho - 1) * 2 + 1, kw + (Wo - 1) * 2 + 1, C),
                (1, 2, 2, 1),
            )
            slabs.append(sl.reshape(M, C))

    if M <= 1024:
        tm, Mp = M, M
    else:
        tm = 512
        Mp = _round_up(M, tm)
        slabs = [_pad_rows(s, Mp) for s in slabs]

    def kernel(*refs):
        o_ref = refs[-1]
        m = refs[0][...]
        for r in refs[1:-1]:
            m = jnp.maximum(m, r[...])
        o_ref[...] = m

    out = pl.pallas_call(
        kernel,
        out_shape=jax.ShapeDtypeStruct((Mp, C), x.dtype),
        grid=(Mp // tm,),
        in_specs=[pl.BlockSpec((tm, C), lambda i: (i, 0))] * 9,
        out_specs=pl.BlockSpec((tm, C), lambda i: (i, 0)),
        compiler_params=pltpu.CompilerParams(
            dimension_semantics=("parallel",),
            vmem_limit_bytes=VMEM_LIMIT,
        ),
    )(*slabs)
    if Mp != M:
        out = out[:M]
    return out.reshape(N, Ho, Wo, C)


@jax.jit
def gap_bn1d(x, scale, shift):
    """Global average pool over spatial + BatchNorm1d bottleneck (folded eval stats).
    Gridded over the batch dim; outputs f32 features."""
    N, HW, C = x.shape

    def kernel(x_ref, s_ref, b_ref, ft_ref, fi_ref):
        ft = jnp.mean(x_ref[...].astype(jnp.float32), axis=1)
        ft_ref[...] = ft
        fi_ref[...] = ft * s_ref[...] + b_ref[...]

    return pl.pallas_call(
        kernel,
        out_shape=(
            jax.ShapeDtypeStruct((N, C), F32),
            jax.ShapeDtypeStruct((N, C), F32),
        ),
        grid=(N,),
        in_specs=[
            pl.BlockSpec((1, HW, C), lambda n: (n, 0, 0)),
            pl.BlockSpec((1, C), lambda n: (0, 0)),
            pl.BlockSpec((1, C), lambda n: (0, 0)),
        ],
        out_specs=(
            pl.BlockSpec((1, C), lambda n: (n, 0)),
            pl.BlockSpec((1, C), lambda n: (n, 0)),
        ),
        compiler_params=pltpu.CompilerParams(
            dimension_semantics=("parallel",),
            vmem_limit_bytes=VMEM_LIMIT,
        ),
    )(x, scale.reshape(1, C).astype(F32), shift.reshape(1, C).astype(F32))


# ----------------------------------------------------------------------------
# Conv glue: im2col (data movement, bf16) + tiled Pallas matmul (compute)
# ----------------------------------------------------------------------------
def _im2col(x, k, stride, pad):
    N, H, W, C = x.shape
    Ho = (H + 2 * pad - k) // stride + 1
    Wo = (W + 2 * pad - k) // stride + 1
    if k == 1 and stride == 1 and pad == 0:
        return x.reshape(N * H * W, C), (N, Ho, Wo)
    xp = jnp.pad(x, ((0, 0), (pad, pad), (pad, pad), (0, 0)))
    cols = []
    for kh in range(k):
        for kw in range(k):
            sl = lax.slice(
                xp,
                (0, kh, kw, 0),
                (N, kh + (Ho - 1) * stride + 1, kw + (Wo - 1) * stride + 1, C),
                (1, stride, stride, 1),
            )
            cols.append(sl)
    patches = jnp.stack(cols, axis=3)  # [N, Ho, Wo, k*k, C]
    return patches.reshape(N * Ho * Wo, k * k * C), (N, Ho, Wo)


@functools.partial(jax.jit, static_argnames=("k", "stride", "pad", "relu"))
def conv2d(x, w, scale, shift, residual=None, *, k, stride, pad, relu=False):
    cols, (N, Ho, Wo) = _im2col(x, k, stride, pad)
    res = None
    if residual is not None:
        res = residual.reshape(N * Ho * Wo, residual.shape[-1])
    y = matmul_affine(cols, w, scale, shift, res, relu=relu, out_dtype=BF16)
    return y.reshape(N, Ho, Wo, w.shape[1])


# ----------------------------------------------------------------------------
# Deterministic parameter construction (synthetic init; no checkpoint loading)
# ----------------------------------------------------------------------------
def _conv_w(key, k, cin, cout):
    std = (2.0 / (k * k * cin)) ** 0.5
    w = jax.random.normal(key, (k, k, cin, cout), dtype=F32) * std
    return w.reshape(k * k * cin, cout).astype(BF16)  # bf16 MXU weights


def _bn_fold(c):
    # gamma=1, beta=0, running_mean=0, running_var=1  (eval-mode fold)
    scale = jnp.full((c,), 1.0 / (1.0 + BN_EPS) ** 0.5, F32)
    shift = jnp.zeros((c,), F32)
    return scale, shift


def init_params(seed=0):
    keys = iter(jax.random.split(jax.random.PRNGKey(seed), 160))
    p = {}
    p["conv1"] = _conv_w(next(keys), 7, 3, 64)
    p["bn1"] = _bn_fold(64)

    layers = []
    inplanes = 64
    # resnet101_ibn_a: layers=(3,4,23,3), ibn_cfg=('a','a','a',None)
    cfg = [(64, 3, 1, "a"), (128, 4, 2, "a"), (256, 23, 2, "a"), (512, 3, 2, None)]
    for planes, nblocks, stride, ibn in cfg:
        blocks = []
        for bi in range(nblocks):
            s = stride if bi == 0 else 1
            blk = {"stride": s, "ibn": ibn, "planes": planes}
            blk["conv1"] = _conv_w(next(keys), 1, inplanes, planes)
            if ibn == "a":
                half = planes // 2
                bn_s, bn_b = _bn_fold(planes - half)
                in_gamma = jnp.ones((half,), F32)
                in_beta = jnp.zeros((half,), F32)
                blk["ones_p"] = jnp.ones((planes,), F32)
                blk["zeros_p"] = jnp.zeros((planes,), F32)
                # extended per-channel params for the fused IBN kernel
                blk["ibn_g"] = jnp.concatenate(
                    [in_gamma, jnp.zeros((planes - half,), F32)]).reshape(1, planes)
                blk["ibn_s"] = jnp.concatenate(
                    [jnp.zeros((half,), F32), bn_s]).reshape(1, planes)
                blk["ibn_b"] = jnp.concatenate(
                    [in_beta, bn_b]).reshape(1, planes)
            else:
                blk["bn1"] = _bn_fold(planes)
            blk["conv2"] = _conv_w(next(keys), 3, planes, planes)
            blk["bn2"] = _bn_fold(planes)
            blk["conv3"] = _conv_w(next(keys), 1, planes, planes * 4)
            blk["bn3"] = _bn_fold(planes * 4)
            if bi == 0 and (s != 1 or inplanes != planes * 4):
                blk["ds_conv"] = _conv_w(next(keys), 1, inplanes, planes * 4)
                blk["ds_bn"] = _bn_fold(planes * 4)
            blocks.append(blk)
            inplanes = planes * 4
        layers.append(blocks)
    p["layers"] = layers

    # bottleneck BatchNorm1d (weights_init_kaiming -> gamma=1, beta=0)
    p["bottleneck"] = _bn_fold(EMBED_DIM)
    # classifier Linear(2048 -> 576, bias=False), normal std=0.001, stored transposed
    p["classifier"] = (jax.random.normal(next(keys), (EMBED_DIM, NUM_CLASSES), F32)
                       * 0.001).astype(BF16)
    p["cls_scale"] = jnp.ones((NUM_CLASSES,), F32)
    p["cls_shift"] = jnp.zeros((NUM_CLASSES,), F32)
    return p


# ----------------------------------------------------------------------------
# Forward pass
# ----------------------------------------------------------------------------
def bottleneck_forward(x, blk):
    s = blk["stride"]
    if blk["ibn"] == "a":
        # raw 1x1 conv (identity affine), then fused IBN-a (IN half / BN half + relu)
        raw = conv2d(x, blk["conv1"], blk["ones_p"], blk["zeros_p"],
                     k=1, stride=1, pad=0, relu=False)
        N, Ho, Wo, C = raw.shape
        out = ibn_a_relu(raw.reshape(N, Ho * Wo, C),
                         blk["ibn_g"], blk["ibn_s"], blk["ibn_b"])
        out = out.reshape(N, Ho, Wo, C)
    else:
        s1, b1 = blk["bn1"]
        out = conv2d(x, blk["conv1"], s1, b1, k=1, stride=1, pad=0, relu=True)

    s2, b2 = blk["bn2"]
    out = conv2d(out, blk["conv2"], s2, b2, k=3, stride=s, pad=1, relu=True)

    if "ds_conv" in blk:
        dss, dsb = blk["ds_bn"]
        residual = conv2d(x, blk["ds_conv"], dss, dsb,
                          k=1, stride=s, pad=0, relu=False)
    else:
        residual = x

    s3, b3 = blk["bn3"]
    out = conv2d(out, blk["conv3"], s3, b3, k=1, stride=1, pad=0,
                 residual=residual, relu=True)
    return out


def resnet101_ibn_a_forward(x_nchw, p):
    """Returns (f_t, f_i, out) exactly like Resnet101IbnA.forward."""
    x = jnp.transpose(x_nchw.astype(F32), (0, 2, 3, 1)).astype(BF16)  # NCHW -> NHWC bf16
    # stem: conv7x7/2 + BN + relu + maxpool3x3/2
    x = conv2d(x, p["conv1"], p["bn1"][0], p["bn1"][1],
               k=7, stride=2, pad=3, relu=True)
    x = maxpool_3x3_s2(x)
    for blocks in p["layers"]:
        for blk in blocks:
            x = bottleneck_forward(x, blk)
    N, H, W, C = x.shape
    f_t, f_i = gap_bn1d(x.reshape(N, H * W, C), p["bottleneck"][0], p["bottleneck"][1])
    out = matmul_affine(f_i, p["classifier"], p["cls_scale"], p["cls_shift"],
                        relu=False, out_dtype=F32)
    return f_t, f_i, out


# ----------------------------------------------------------------------------
if __name__ == "__main__":
    key = jax.random.PRNGKey(0)
    # small-but-valid input: batch=2, 3 channels, 64x64 spatial (survives /32 downsampling)
    x = jax.random.normal(key, (2, 3, 64, 64), dtype=F32)
    params = init_params(seed=0)

    f_t, f_i, out = resnet101_ibn_a_forward(x, params)
    jax.block_until_ready((f_t, f_i, out))

    assert f_t.shape == (2, EMBED_DIM)
    assert f_i.shape == (2, EMBED_DIM)
    assert out.shape == (2, NUM_CLASSES)
    assert bool(jnp.all(jnp.isfinite(f_t)))
    assert bool(jnp.all(jnp.isfinite(f_i)))
    assert bool(jnp.all(jnp.isfinite(out)))
    print("KERNEL_OK")
</pallas_src>

<mosaic_0001>
module attributes {stable_mosaic.version = 11 : i64} {
  func.func @kernel(%arg0: i32, %arg1: i32, %arg2: i32, %arg3: memref<256x147xbf16, #tpu.memory_space<vmem>>, %arg4: memref<147x64xbf16, #tpu.memory_space<vmem>>, %arg5: memref<1x64xf32, #tpu.memory_space<vmem>>, %arg6: memref<1x64xf32, #tpu.memory_space<vmem>>, %arg7: memref<256x64xbf16, #tpu.memory_space<vmem>>, %arg8: memref<256x64xf32, #tpu.memory_space<vmem>>) attributes {dimension_semantics = [#tpu.dimension_semantics<parallel>, #tpu.dimension_semantics<parallel>, #tpu.dimension_semantics<arbitrary>], iteration_bounds = array<i64: 8, 1, 1>, scalar_prefetch = 0 : i64, scratch_operands = 1 : i64, tpu.core_type = #tpu.core_type<tc>, window_params = [{transform_indices = @transform_0, window_bounds = array<i64: 256, 147>}, {transform_indices = @transform_1, window_bounds = array<i64: 147, 64>}, {transform_indices = @transform_2, window_bounds = array<i64: 1, 64>}, {transform_indices = @transform_3, window_bounds = array<i64: 1, 64>}, {transform_indices = @transform_4, window_bounds = array<i64: 256, 64>}]} {
    %c0_i32 = arith.constant 0 : i32
    %0 = arith.cmpi eq, %arg2, %c0_i32 : i32
    %1 = arith.extui %0 : i1 to i32
    %c0_i32_0 = arith.constant 0 : i32
    %2 = arith.cmpi ne, %1, %c0_i32_0 : i32
    scf.if %2 {
      %cst_10 = arith.constant 0.000000e+00 : f32
      %12 = vector.broadcast %cst_10 : f32 to vector<256x64xf32>
      %c0_11 = arith.constant 0 : index
      %c0_12 = arith.constant 0 : index
      %13 = vector.load %arg8[%c0_11, %c0_12] : memref<256x64xf32, #tpu.memory_space<vmem>>, vector<256x64xf32>
      tpu.vector_store %arg8[%c0_11, %c0_12], %12 {strides = array<i32>} : memref<256x64xf32, #tpu.memory_space<vmem>>, vector<256x64xf32>,
    } else {
    }
    %c0 = arith.constant 0 : index
    %c0_1 = arith.constant 0 : index
    %3 = vector.load %arg8[%c0, %c0_1] : memref<256x64xf32, #tpu.memory_space<vmem>>, vector<256x64xf32>
    %c0_2 = arith.constant 0 : index
    %c0_3 = arith.constant 0 : index
    %4 = vector.load %arg3[%c0_2, %c0_3] : memref<256x147xbf16, #tpu.memory_space<vmem>>, vector<256x147xbf16>
    %c0_4 = arith.constant 0 : index
    %c0_5 = arith.constant 0 : index
    %5 = vector.load %arg4[%c0_4, %c0_5] : memref<147x64xbf16, #tpu.memory_space<vmem>>, vector<147x64xbf16>
    %cst = arith.constant dense<0.000000e+00> : vector<256x64xf32>
    %6 = tpu.matmul %4, %5, %cst {dimension_numbers = #tpu.dot_dimension_numbers<[1], [0], [0], [1], [0, 0, 1, 1], [], []>} : vector<256x147xbf16>, vector<147x64xbf16>, vector<256x64xf32> -> vector<256x64xf32>
    %7 = arith.addf %3, %6 : vector<256x64xf32>
    %c0_6 = arith.constant 0 : index
    %c0_7 = arith.constant 0 : index
    %8 = vector.load %arg8[%c0_6, %c0_7] : memref<256x64xf32, #tpu.memory_space<vmem>>, vector<256x64xf32>
    tpu.vector_store %arg8[%c0_6, %c0_7], %7 {strides = array<i32>} : memref<256x64xf32, #tpu.memory_space<vmem>>, vector<256x64xf32>,
    %c0_i32_8 = arith.constant 0 : i32
    %9 = arith.cmpi eq, %arg2, %c0_i32_8 : i32
    %10 = arith.extui %9 : i1 to i32
    %c0_i32_9 = arith.constant 0 : i32
    %11 = arith.cmpi ne, %10, %c0_i32_9 : i32
    scf.if %11 {
      %c0_10 = arith.constant 0 : index
      %c0_11 = arith.constant 0 : index
      %12 = vector.load %arg8[%c0_10, %c0_11] : memref<256x64xf32, #tpu.memory_space<vmem>>, vector<256x64xf32>
      %c0_12 = arith.constant 0 : index
      %c0_13 = arith.constant 0 : index
      %13 = vector.load %arg5[%c0_12, %c0_13] : memref<1x64xf32, #tpu.memory_space<vmem>>, vector<1x64xf32>
      %14 = vector.broadcast %13 : vector<1x64xf32> to vector<256x64xf32>
      %15 = arith.mulf %12, %14 : vector<256x64xf32>
      %c0_14 = arith.constant 0 : index
      %c0_15 = arith.constant 0 : index
      %16 = vector.load %arg6[%c0_14, %c0_15] : memref<1x64xf32, #tpu.memory_space<vmem>>, vector<1x64xf32>
      %17 = vector.broadcast %16 : vector<1x64xf32> to vector<256x64xf32>
      %18 = arith.addf %15, %17 : vector<256x64xf32>
      %cst_16 = arith.constant 0.000000e+00 : f32
      %19 = vector.broadcast %cst_16 : f32 to vector<256x64xf32>
      %20 = arith.maximumf %18, %19 : vector<256x64xf32>
      %21 = arith.truncf %20 : vector<256x64xf32> to vector<256x64xbf16>
      %c0_17 = arith.constant 0 : index
      %c0_18 = arith.constant 0 : index
      %22 = vector.load %arg7[%c0_17, %c0_18] : memref<256x64xbf16, #tpu.memory_space<vmem>>, vector<256x64xbf16>
      tpu.vector_store %arg7[%c0_17, %c0_18], %21 {strides = array<i32>} : memref<256x64xbf16, #tpu.memory_space<vmem>>, vector<256x64xbf16>,
    } else {
    }
    return
  }
  func.func @transform_0(%arg0: i32, %arg1: i32, %arg2: i32) -> (i32, i32) {
    %c0_i32 = arith.constant 0 : i32
    return %arg0, %arg2 : i32, i32
  }
  func.func @transform_1(%arg0: i32, %arg1: i32, %arg2: i32) -> (i32, i32) {
    %c0_i32 = arith.constant 0 : i32
    return %arg2, %arg1 : i32, i32
  }
  func.func @transform_2(%arg0: i32, %arg1: i32, %arg2: i32) -> (i32, i32) {
    %c0_i32 = arith.constant 0 : i32
    %c0_i32_0 = arith.constant 0 : i32
    return %c0_i32, %arg1 : i32, i32
  }
  func.func @transform_3(%arg0: i32, %arg1: i32, %arg2: i32) -> (i32, i32) {
    %c0_i32 = arith.constant 0 : i32
    %c0_i32_0 = arith.constant 0 : i32
    return %c0_i32, %arg1 : i32, i32
  }
  func.func @transform_4(%arg0: i32, %arg1: i32, %arg2: i32) -> (i32, i32) {
    %c0_i32 = arith.constant 0 : i32
    return %arg0, %arg1 : i32, i32
  }
}

</mosaic_0001>

<bundles_post_ra>
// kernel: matmul_affine.1
= control target key start
LH: loop header
LB: loop body
LE: loop exit
PB: predicated region body
PF: predicated region fallthrough
CT: control target
= control target key end

     0   :  { %s1641_s15 = smov 0   ;;  %s1643_s16 = smov 0   ;;  %s1984_s0 = inlined_call_operand.vmem [shape: bf16[2048,147], index: 0, kind: input, shape index: {}]   ;;  %s1985_s1 = inlined_call_operand.vmem [shape: bf16[147,64], index: 1, kind: input, shape index: {}]   ;;  %s1986_s2 = inlined_call_operand.vmem [shape: f32[1,64], index: 2, kind: input, shape index: {}]   ;;  %s1987_s3 = inlined_call_operand.vmem [shape: f32[1,64], index: 3, kind: input, shape index: {}]   ;;  %s1988_s4 = inlined_call_operand.vmem [shape: bf16[2048,64], index: 4, kind: output, shape index: {}]  }
   0x1   :  { %s1645_s17 = smov 0  }
   0x2 LB: > { %s33_s18 = sadd.s32 1, %s1607_s16  ;;  %p1351_p0 = scmp.ge.s32.totalorder %s1611_s17, 1  ;;  %s1611_s17 = sphi %s1645_s17, %s14_s17   ;;  %s1607_s16 = sphi %s1643_s16, %s1990_s16   ;;  %s1603_s15 = sphi %s1641_s15, %s1989_s15  }
   0x3   : > { %p35_p1 = scmp.ge.s32.totalorder %s33_s18, 8  ;;  %p224_p2 = scmp.lt.s32.totalorder %s1611_s17, 9 }
   0x5   : > { %s1992_s18 = smov (%p35_p1, %s33_s18), 0  ;;  %p225_p3 = pnand %p1351_p0, %p224_p2 }
   0x6   : > { %v1531_v0 = vld [vmem:[%s1985_s1] sm:$0xff] (!%p225_p3)   ;;  %v1613_v1 = vmov (!%p225_p3), 0   ;;  %v1532_v2 = vld [vmem:[%s1985_s1 + $0x8] sm:$0xff] (!%p225_p3)   ;;  %v1533_v3 = vld [vmem:[%s1985_s1 + $0x10] sm:$0xff] (!%p225_p3)   ;;  %s1352_s25 = sshll.u32 (!%p225_p3), %s1603_s15, 5  ;;  %vm313_vm0 = vcmask (!%p225_p3), 523264  }
   0x7   : > { %228 = sbr.rel (%p225_p3) target bundleno = 338 (0x152), region = 36  ;;  %686 = vmatprep.subr.bf16.mxu0 (!%p225_p3), %v1613_v1  ;;  %1484 = vmatprep.subr.bf16.mxu1 (!%p225_p3), %v1613_v1  ;;  %p274_p4 = scmp.lt.s32.totalorder (!%p225_p3), %s1352_s25, 255  ;;  %v1534_v4 = vld [vmem:[%s1985_s1 + $0x18] sm:$0xff] (!%p225_p3)   ;;  %v1614_v5 = vmov (!%p225_p3), 0.0   ;;  %v1535_v6 = vld [vmem:[%s1985_s1 + $0x20] sm:$0xff] (!%p225_p3)   ;;  %vm630_vm1 = vcmask (!%p225_p3), 154624  }
   0x8   : > { %687 = vmatpush1.bf16.msra.mxu0 (!%p225_p3), %v1531_v0  ;;  %1494 = vmatpush1.bf16.msra.mxu1 (!%p225_p3), %v1531_v0  ;;  %314 = vst.msk [vmem:[#allocation2] sm:$0xff] (!%p225_p3), %vm313_vm0, %v1614_v5  ;;  %315 = vst.msk [vmem:[#allocation2 + $0x8] sm:$0xff] (!%p225_p3), %vm313_vm0, %v1614_v5  ;;  %v1536_v9 = vld [vmem:[%s1985_s1 + $0x28] sm:$0xff] (!%p225_p3)   ;;  %v1537_v10 = vld [vmem:[%s1985_s1 + $0x30] sm:$0xff] (!%p225_p3)   ;;  %vm679_vm2 = vcmask (!%p225_p3), 1040384   ;;  %vm680_vm3 = vcmask (!%p225_p3), 1041408  }
   0x9   : > { %688 = vmatprep.subr.bf16.mxu0 (!%p225_p3), %v1613_v1  ;;  %1485 = vmatprep.subr.bf16.mxu1 (!%p225_p3), %v1613_v1  ;;  %316 = vst.msk [vmem:[#allocation2 + $0x10] sm:$0xff] (!%p225_p3), %vm313_vm0, %v1614_v5  ;;  %317 = vst.msk [vmem:[#allocation2 + $0x18] sm:$0xff] (!%p225_p3), %vm313_vm0, %v1614_v5  ;;  %v1538_v11 = vld [vmem:[%s1985_s1 + $0x38] sm:$0xff] (!%p225_p3)   ;;  %v1615_v12 = vmov (!%p225_p3), 65535   ;;  %v1539_v14 = vld [vmem:[%s1985_s1 + $0x40] sm:$0xff] (!%p225_p3)   ;;  %vm1185_vm4 = vcmask (!%p225_p3), 519168  }
   0xa   : > { %318 = vst.msk [vmem:[#allocation2 + $0x20] sm:$0xff] (!%p225_p3), %vm313_vm0, %v1614_v5  ;;  %319 = vst.msk [vmem:[#allocation2 + $0x28] sm:$0xff] (!%p225_p3), %vm313_vm0, %v1614_v5  ;;  %v681_v13 = vsel (!%p225_p3), %vm679_vm2, 4294967295, %v1615_v12  ;;  %v1540_v15 = vld [vmem:[%s1985_s1 + $0x48] ss:$0 sps:$4 sm:$0x33] (!%p225_p3)  }
   0xb   : > { %320 = vst.msk [vmem:[#allocation2 + $0x30] sm:$0xff] (!%p225_p3), %vm313_vm0, %v1614_v5  ;;  %321 = vst.msk [vmem:[#allocation2 + $0x38] sm:$0xff] (!%p225_p3), %vm313_vm0, %v1614_v5  ;;  %v682_v16 = vsel (!%p225_p3), %vm680_vm3, %v681_v13, 0  ;;  %v1811_v12 = vld [vmem:[%s1987_s3] ss:$0 sm:$0xff] (!%p225_p3) }
   0xc   : > { %689 = vmatpush1.bf16.msra.mxu0 (!%p225_p3), %v1532_v2  ;;  %1495 = vmatpush1.bf16.msra.mxu1 (!%p225_p3), %v1532_v2  ;;  %322 = vst.msk [vmem:[#allocation2 + $0x40] sm:$0xff] (!%p225_p3), %vm313_vm0, %v1614_v5  ;;  %323 = vst.msk [vmem:[#allocation2 + $0x48] sm:$0xff] (!%p225_p3), %vm313_vm0, %v1614_v5  ;;  %v684_v17 = vand.u32 (!%p225_p3), %v1540_v15, %v682_v16  ;;  %v1806_v2 = vld [vmem:[%s1986_s2] ss:$0 sm:$0xff] (!%p225_p3) }
   0xd   : > { %690 = vmatprep.subr.bf16.mxu0 (!%p225_p3), %v1613_v1  ;;  %1486 = vmatprep.subr.bf16.mxu1 (!%p225_p3), %v1613_v1  ;;  %324 = vst.msk [vmem:[#allocation2 + $0x50] sm:$0xff] (!%p225_p3), %vm313_vm0, %v1614_v5  ;;  %325 = vst.msk [vmem:[#allocation2 + $0x58] sm:$0xff] (!%p225_p3), %vm313_vm0, %v1614_v5 }
   0xe   : > { %s1994_s25 = smov (!%p274_p4, %s1352_s25), 255  ;;  %326 = vst.msk [vmem:[#allocation2 + $0x60] sm:$0xff] %vm313_vm0, %v1614_v5  ;;  %327 = vst.msk [vmem:[#allocation2 + $0x68] sm:$0xff] %vm313_vm0, %v1614_v5 }
   0xf   : > { %s1451_s28 = sshll.u32 %s1994_s25, 3  ;;  %328 = vst.msk [vmem:[#allocation2 + $0x70] sm:$0xff] %vm313_vm0, %v1614_v5  ;;  %329 = vst.msk [vmem:[#allocation2 + $0x78] sm:$0xff] %vm313_vm0, %v1614_v5  ;;  %v346_v48 = vld [vmem:[#allocation2] sm:$0xff]  ;;  %v347_v52 = vld [vmem:[#allocation2 + $0x8] sm:$0xff]  ;;  %s1356_s26 = sshll.u32 %s1994_s25, 2 }
  0x10   : > { %691 = vmatpush1.bf16.msra.mxu0 %v1533_v3  ;;  %1496 = vmatpush1.bf16.msra.mxu1 %v1533_v3  ;;  %330 = vst.msk [vmem:[#allocation2 + $0x80] sm:$0xff] %vm313_vm0, %v1614_v5  ;;  %331 = vst.msk [vmem:[#allocation2 + $0x88] sm:$0xff] %vm313_vm0, %v1614_v5  ;;  %s1719_s5 = scalar_lea.vmem %s1984_s0, %s1451_s28  ;;  %v348_v0 = vld [vmem:[#allocation2 + $0x10] sm:$0xff]  ;;  %s1829_s28 = scalar_lea.vmem %s1988_s4, %s1356_s26 }
  0x11   : > { %692 = vmatprep.subr.bf16.mxu0 %v1613_v1  ;;  %1487 = vmatprep.subr.bf16.mxu1 %v1613_v1  ;;  %332 = vst.msk [vmem:[#allocation2 + $0x90] sm:$0xff] %vm313_vm0, %v1614_v5  ;;  %333 = vst.msk [vmem:[#allocation2 + $0x98] sm:$0xff] %vm313_vm0, %v1614_v5  ;;  %v1543_v7 = vld [vmem:[%s1719_s5 + $0x4] ss:$8 sps:$4 sm:$0xff]   ;;  %v1541_v18 = vld [vmem:[%s1719_s5] ss:$8 sps:$4 sm:$0xff]  }
  0x12   : > { %334 = vst.msk [vmem:[#allocation2 + $0xa0] sm:$0xff] %vm313_vm0, %v1614_v5  ;;  %335 = vst.msk [vmem:[#allocation2 + $0xa8] sm:$0xff] %vm313_vm0, %v1614_v5  ;;  %v1546_v8 = vld [vmem:[%s1719_s5 + $0x84] ss:$8 sps:$4 sm:$0xff]   ;;  %1399 = vmatprep.mubr.msk.bf16.mxu0 %vm630_vm1, %v1543_v7  ;;  %v1544_v19 = vld [vmem:[%s1719_s5 + $0x80] ss:$8 sps:$4 sm:$0xff]  }
  0x13   : > { %336 = vst.msk [vmem:[#allocation2 + $0xb0] sm:$0xff] %vm313_vm0, %v1614_v5  ;;  %337 = vst.msk [vmem:[#allocation2 + $0xb8] sm:$0xff] %vm313_vm0, %v1614_v5  ;;  %1407 = vmatprep.mubr.msk.bf16.mxu1 %vm630_vm1, %v1546_v8  ;;  %v1547_v20 = vld [vmem:[%s1719_s5 + $0x14] ss:$8 sps:$4 sm:$0xff]   ;;  %v1551_v22 = vld [vmem:[%s1719_s5 + $0x10] ss:$8 sps:$4 sm:$0xff]  }
  0x14   : > { %338 = vst.msk [vmem:[#allocation2 + $0xc0] sm:$0xff] %vm313_vm0, %v1614_v5  ;;  %339 = vst.msk [vmem:[#allocation2 + $0xc8] sm:$0xff] %vm313_vm0, %v1614_v5  ;;  %693 = vmatpush1.bf16.msra.mxu0 %v1534_v4  ;;  %1497 = vmatpush1.bf16.msra.mxu1 %v1534_v4  ;;  %v1549_v21 = vld [vmem:[%s1719_s5 + $0x94] ss:$8 sps:$4 sm:$0xff]   ;;  %v1552_v23 = vld [vmem:[%s1719_s5 + $0x90] ss:$8 sps:$4 sm:$0xff]  }
  0x15   : > { %340 = vst.msk [vmem:[#allocation2 + $0xd0] sm:$0xff] %vm313_vm0, %v1614_v5  ;;  %341 = vst.msk [vmem:[#allocation2 + $0xd8] sm:$0xff] %vm313_vm0, %v1614_v5  ;;  %694 = vmatprep.subr.bf16.mxu0 %v1613_v1  ;;  %1488 = vmatprep.subr.bf16.mxu1 %v1613_v1  ;;  %v1553_v24 = vld [vmem:[%s1719_s5 + $0x24] ss:$8 sps:$4 sm:$0xff]   ;;  %v1557_v26 = vld [vmem:[%s1719_s5 + $0x20] ss:$8 sps:$4 sm:$0xff]  }
  0x16   : > { %342 = vst.msk [vmem:[#allocation2 + $0xe0] sm:$0xff] %vm313_vm0, %v1614_v5  ;;  %343 = vst.msk [vmem:[#allocation2 + $0xe8] sm:$0xff] %vm313_vm0, %v1614_v5  ;;  %v1555_v25 = vld [vmem:[%s1719_s5 + $0xa4] ss:$8 sps:$4 sm:$0xff]   ;;  %v1558_v27 = vld [vmem:[%s1719_s5 + $0xa0] ss:$8 sps:$4 sm:$0xff]  }
  0x17   : > { %344 = vst.msk [vmem:[#allocation2 + $0xf0] sm:$0xff] %vm313_vm0, %v1614_v5  ;;  %345 = vst.msk [vmem:[#allocation2 + $0xf8] sm:$0xff] %vm313_vm0, %v1614_v5  ;;  %v1559_v28 = vld [vmem:[%s1719_s5 + $0x34] ss:$8 sps:$4 sm:$0xff]   ;;  %v1563_v30 = vld [vmem:[%s1719_s5 + $0x30] ss:$8 sps:$4 sm:$0xff]  }
  0x18   : > { %695 = vmatpush1.bf16.msra.mxu0 %v1535_v6  ;;  %1498 = vmatpush1.bf16.msra.mxu1 %v1535_v6  ;;  %v1561_v29 = vld [vmem:[%s1719_s5 + $0xb4] ss:$8 sps:$4 sm:$0xff]   ;;  %v1564_v31 = vld [vmem:[%s1719_s5 + $0xb0] ss:$8 sps:$4 sm:$0xff]   ;;  %v1565_v32 = vld [vmem:[%s1719_s5 + $0x44] ss:$8 sps:$4 sm:$0xff]  }
  0x19   : > { %696 = vmatprep.subr.bf16.mxu0 %v1613_v1  ;;  %1489 = vmatprep.subr.bf16.mxu1 %v1613_v1  ;;  %v1567_v33 = vld [vmem:[%s1719_s5 + $0xc4] ss:$8 sps:$4 sm:$0xff]   ;;  %v1569_v34 = vld [vmem:[%s1719_s5 + $0x40] ss:$8 sps:$4 sm:$0xff]   ;;  %v1571_v36 = vld [vmem:[%s1719_s5 + $0x54] ss:$8 sps:$4 sm:$0xff]  }
  0x1a   : > { %v1570_v35 = vld [vmem:[%s1719_s5 + $0xc0] ss:$8 sps:$4 sm:$0xff]   ;;  %v1573_v37 = vld [vmem:[%s1719_s5 + $0xd4] ss:$8 sps:$4 sm:$0xff]   ;;  %v1575_v38 = vld [vmem:[%s1719_s5 + $0x50] ss:$8 sps:$4 sm:$0xff]  }
  0x1b   : > { %v1576_v39 = vld [vmem:[%s1719_s5 + $0xd0] ss:$8 sps:$4 sm:$0xff]   ;;  %v1577_v40 = vld [vmem:[%s1719_s5 + $0x64] ss:$8 sps:$4 sm:$0xff]   ;;  %v1581_v42 = vld [vmem:[%s1719_s5 + $0x60] ss:$8 sps:$4 sm:$0xff]  }
  0x1c   : > { %697 = vmatpush1.bf16.msra.mxu0 %v1536_v9  ;;  %1499 = vmatpush1.bf16.msra.mxu1 %v1536_v9  ;;  %v1579_v41 = vld [vmem:[%s1719_s5 + $0xe4] ss:$8 sps:$4 sm:$0xff]   ;;  %v1582_v43 = vld [vmem:[%s1719_s5 + $0xe0] ss:$8 sps:$4 sm:$0xff]   ;;  %v1583_v44 = vld [vmem:[%s1719_s5 + $0x74] ss:$8 sps:$4 sm:$0xff]  }
  0x1d   : > { %698 = vmatprep.subr.bf16.mxu0 %v1613_v1  ;;  %1490 = vmatprep.subr.bf16.mxu1 %v1613_v1  ;;  %v1585_v45 = vld [vmem:[%s1719_s5 + $0xf4] ss:$8 sps:$4 sm:$0xff]   ;;  %v1587_v46 = vld [vmem:[%s1719_s5 + $0x70] ss:$8 sps:$4 sm:$0xff]   ;;  %v362_v49 = vld [vmem:[#allocation2 + $0x80] sm:$0xff] }
  0x1e   : > { %v1588_v47 = vld [vmem:[%s1719_s5 + $0xf0] ss:$8 sps:$4 sm:$0xff]   ;;  %v363_v53 = vld [vmem:[#allocation2 + $0x88] sm:$0xff] }
  0x1f   : > { %v349_v5 = vld [vmem:[#allocation2 + $0x18] sm:$0xff] }
  0x20   : > { %699 = vmatpush1.bf16.msra.mxu0 %v1537_v10  ;;  %1500 = vmatpush1.bf16.msra.mxu1 %v1537_v10  ;;  %v365_v6 = vld [vmem:[#allocation2 + $0x98] sm:$0xff] }
  0x21   : > { %700 = vmatprep.subr.bf16.mxu0 %v1613_v1  ;;  %1491 = vmatprep.subr.bf16.mxu1 %v1613_v1 }
  0x24   : > { %701 = vmatpush1.bf16.msra.mxu0 %v1538_v11  ;;  %1501 = vmatpush1.bf16.msra.mxu1 %v1538_v11 }
  0x25   : > { %702 = vmatprep.subr.bf16.mxu0 %v1613_v1  ;;  %1492 = vmatprep.subr.bf16.mxu1 %v1613_v1 }
  0x28   : > { %703 = vmatpush1.bf16.msra.mxu0 %v1539_v14  ;;  %1502 = vmatpush1.bf16.msra.mxu1 %v1539_v14 }
  0x29   : > { %704 = vmatprep.subr.bf16.mxu0 %v1613_v1  ;;  %1493 = vmatprep.subr.bf16.mxu1 %v1613_v1  ;;  %v364_v1 = vld [vmem:[#allocation2 + $0x90] sm:$0xff] }
  0x2c   : > { %705 = vmatpush1.bf16.msra.mxu0 %v684_v17  ;;  %1503 = vmatpush1.bf16.msra.mxu1 %v684_v17 }
  0x2f   : > { %719 = vmatmul.mubr.bf16.vlgmr.msra.gmra.mrb[0].mxu0 %v1541_v18  ;;  %783 = vmatmul.mubr.bf16.vlgmr.msra.gmra.mrb[0].mxu1 %v1544_v19 }
  0x30   : > { %1400 = vmatprep.mubr.msk.bf16.mxu0 %vm630_vm1, %v1547_v20  ;;  %1408 = vmatprep.mubr.msk.bf16.mxu1 %vm630_vm1, %v1549_v21 }
  0x37   : > { %727 = vmatmul.mubr.bf16.gmra.mrb[4].mxu0 %v1551_v22  ;;  %791 = vmatmul.mubr.bf16.gmra.mrb[4].mxu1 %v1552_v23 }
  0x38   : > { %1401 = vmatprep.mubr.msk.bf16.mxu0 %vm630_vm1, %v1553_v24  ;;  %1409 = vmatprep.mubr.msk.bf16.mxu1 %vm630_vm1, %v1555_v25 }
  0x3f   : > { %735 = vmatmul.mubr.bf16.gmra.mrb[8].mxu0 %v1557_v26  ;;  %799 = vmatmul.mubr.bf16.gmra.mrb[8].mxu1 %v1558_v27 }
  0x40   : > { %1402 = vmatprep.mubr.msk.bf16.mxu0 %vm630_vm1, %v1559_v28  ;;  %1410 = vmatprep.mubr.msk.bf16.mxu1 %vm630_vm1, %v1561_v29 }
  0x47   : > { %743 = vmatmul.mubr.bf16.gmra.mrb[12].mxu0 %v1563_v30  ;;  %807 = vmatmul.mubr.bf16.gmra.mrb[12].mxu1 %v1564_v31 }
  0x48   : > { %1403 = vmatprep.mubr.msk.bf16.mxu0 %vm630_vm1, %v1565_v32  ;;  %1411 = vmatprep.mubr.msk.bf16.mxu1 %vm630_vm1, %v1567_v33  ;;  %v350_v32 = vld [vmem:[#allocation2 + $0x20] sm:$0xff] }
  0x49   : > { %v366_v33 = vld [vmem:[#allocation2 + $0xa0] sm:$0xff] }
  0x4f   : > { %751 = vmatmul.mubr.bf16.gmra.mrb[16].mxu0 %v1569_v34  ;;  %815 = vmatmul.mubr.bf16.gmra.mrb[16].mxu1 %v1570_v35 }
  0x50   : > { %1404 = vmatprep.mubr.msk.bf16.mxu0 %vm630_vm1, %v1571_v36  ;;  %1412 = vmatprep.mubr.msk.bf16.mxu1 %vm630_vm1, %v1573_v37 }
  0x57   : > { %759 = vmatmul.mubr.bf16.gmra.mrb[20].mxu0 %v1575_v38  ;;  %823 = vmatmul.mubr.bf16.gmra.mrb[20].mxu1 %v1576_v39 }
  0x58   : > { %1405 = vmatprep.mubr.msk.bf16.mxu0 %vm630_vm1, %v1577_v40  ;;  %1413 = vmatprep.mubr.msk.bf16.mxu1 %vm630_vm1, %v1579_v41 }
  0x5f   : > { %767 = vmatmul.mubr.bf16.gmra.mrb[24].mxu0 %v1581_v42  ;;  %831 = vmatmul.mubr.bf16.gmra.mrb[24].mxu1 %v1582_v43  ;;  %v351_v42 = vld [vmem:[#allocation2 + $0x28] sm:$0xff] }
  0x60   : > { %1406 = vmatprep.mubr.msk.bf16.mxu0 %vm630_vm1, %v1583_v44  ;;  %1414 = vmatprep.mubr.msk.bf16.mxu1 %vm630_vm1, %v1585_v45  ;;  %v367_v43 = vld [vmem:[#allocation2 + $0xa8] sm:$0xff] }
  0x67   : > { %775 = vmatmul.mubr.bf16.gmra.mrb[28].mxu0 %v1587_v46  ;;  %839 = vmatmul.mubr.bf16.gmra.mrb[28].mxu1 %v1588_v47 }
 0x102   : > { %v720_v50 = vpop.f32.mrb[0].mxu0  ;;  %v784_v51 = vpop.f32.mrb[0].mxu1 }
 0x103   : > { %v847_v54 = vadd.f32 %v720_v50, %v346_v48  ;;  %v863_v55 = vadd.f32 %v784_v51, %v362_v49  ;;  %v722_v56 = vpop.f32.mrb[1].mxu0  ;;  %v786_v57 = vpop.f32.mrb[1].mxu1 }
 0x104   : > { %v723_v58 = vpop.f32.mrb[2].mxu0  ;;  %v787_v59 = vpop.f32.mrb[2].mxu1 }
 0x105   : > { %880 = vst.msk [vmem:[#allocation2] sm:$0xff] %vm313_vm0, %v847_v54  ;;  %896 = vst.msk [vmem:[#allocation2 + $0x80] sm:$0xff] %vm313_vm0, %v863_v55  ;;  %v848_v60 = vadd.f32 %v723_v58, %v347_v52  ;;  %v864_v61 = vadd.f32 %v787_v59, %v363_v53  ;;  %v725_v62 = vpop.f32.mrb[3].mxu0  ;;  %v789_v63 = vpop.f32.mrb[3].mxu1 }
 0x107   : > { %881 = vst.msk [vmem:[#allocation2 + $0x8] sm:$0xff] %vm313_vm0, %v848_v60  ;;  %897 = vst.msk [vmem:[#allocation2 + $0x88] sm:$0xff] %vm313_vm0, %v864_v61 }
 0x10a   : > { %v728_v3 = vpop.f32.mrb[4].mxu0  ;;  %v792_v4 = vpop.f32.mrb[4].mxu1 }
 0x10b   : > { %v849_v7 = vadd.f32 %v728_v3, %v348_v0  ;;  %v865_v8 = vadd.f32 %v792_v4, %v364_v1  ;;  %v730_v9 = vpop.f32.mrb[5].mxu0  ;;  %v794_v10 = vpop.f32.mrb[5].mxu1 }
 0x10c   : > { %v915_v11 = vld [vmem:[#allocation2] sm:$0xff]  ;;  %v731_v14 = vpop.f32.mrb[6].mxu0  ;;  %v795_v15 = vpop.f32.mrb[6].mxu1  ;;  %v353_v9 = vld [vmem:[#allocation2 + $0x38] sm:$0xff] }
 0x10d   : > { %v931_v13 = vld [vmem:[#allocation2 + $0x80] sm:$0xff]  ;;  %v954_v16 = vmul.f32 %v1806_v2, %v915_v11  ;;  %882 = vst.msk [vmem:[#allocation2 + $0x10] sm:$0xff] %vm313_vm0, %v849_v7  ;;  %898 = vst.msk [vmem:[#allocation2 + $0x90] sm:$0xff] %vm313_vm0, %v865_v8  ;;  %v850_v18 = vadd.f32 %v731_v14, %v349_v5  ;;  %v866_v19 = vadd.f32 %v795_v15, %v365_v6  ;;  %v733_v20 = vpop.f32.mrb[7].mxu0  ;;  %v797_v21 = vpop.f32.mrb[7].mxu1  ;;  %v352_v5 = vld [vmem:[#allocation2 + $0x30] sm:$0xff] }
 0x10e   : > { %v970_v17 = vmul.f32 %v1806_v2, %v931_v13  ;;  %v916_v22 = vld [vmem:[#allocation2 + $0x8] sm:$0xff]  ;;  %v368_v6 = vld [vmem:[#allocation2 + $0xb0] sm:$0xff]  ;;  %v369_v10 = vld [vmem:[#allocation2 + $0xb8] sm:$0xff] }
 0x10f   : > { %v932_v23 = vld [vmem:[#allocation2 + $0x88] sm:$0xff]  ;;  %v993_v24 = vadd.f32 %v1811_v12, %v954_v16  ;;  %v955_v26 = vmul.f32 %v1806_v2, %v916_v22  ;;  %883 = vst.msk [vmem:[#allocation2 + $0x18] sm:$0xff] %vm313_vm0, %v850_v18  ;;  %899 = vst.msk [vmem:[#allocation2 + $0x98] sm:$0xff] %vm313_vm0, %v866_v19 }
 0x110   : > { %v1009_v25 = vadd.f32 %v1811_v12, %v970_v17  ;;  %v971_v27 = vmul.f32 %v1806_v2, %v932_v23 }
 0x111   : > { %v1025_v28 = vmax.f32 %v993_v24, 0.0  ;;  %v994_v30 = vadd.f32 %v1811_v12, %v955_v26 }
 0x112   : > { %v1041_v29 = vmax.f32 %v1009_v25, 0.0  ;;  %v1010_v31 = vadd.f32 %v1811_v12, %v971_v27  ;;  %v736_v34 = vpop.f32.mrb[8].mxu0  ;;  %v800_v35 = vpop.f32.mrb[8].mxu1 }
 0x113   : > { %v1452_v36 = vpack.c.bf16 %v1025_v28, %v1025_v28  ;;  %v1026_v38 = vmax.f32 %v994_v30, 0.0  ;;  %v738_v40 = vpop.f32.mrb[9].mxu0  ;;  %v802_v41 = vpop.f32.mrb[9].mxu1  ;;  %v851_v46 = vadd.f32 %v736_v34, %v350_v32  ;;  %v867_v47 = vadd.f32 %v800_v35, %v366_v33 }
 0x114   : > { %v1468_v37 = vpack.c.bf16 %v1041_v29, %v1041_v29  ;;  %v1042_v39 = vmax.f32 %v1010_v31, 0.0  ;;  %v917_v44 = vld [vmem:[#allocation2 + $0x10] sm:$0xff]  ;;  %v739_v48 = vpop.f32.mrb[10].mxu0  ;;  %v803_v49 = vpop.f32.mrb[10].mxu1 }
 0x115   : > { %v933_v45 = vld [vmem:[#allocation2 + $0x90] sm:$0xff]  ;;  %1186 = vst.msk [vmem:[%s1829_s28] sm:$0xf] %vm1185_vm4, %v1452_v36  ;;  %v1453_v50 = vpack.c.bf16 %v1026_v38, %v1026_v38  ;;  %v956_v52 = vmul.f32 %v1806_v2, %v917_v44  ;;  %v741_v54 = vpop.f32.mrb[11].mxu0  ;;  %v805_v55 = vpop.f32.mrb[11].mxu1  ;;  %v852_v58 = vadd.f32 %v739_v48, %v351_v42  ;;  %v868_v59 = vadd.f32 %v803_v49, %v367_v43  ;;  %v354_v38 = vld [vmem:[#allocation2 + $0x40] sm:$0xff] }
 0x116   : > { %1202 = vst.msk [vmem:[%s1829_s28 + $0x40] sm:$0xf] %vm1185_vm4, %v1468_v37  ;;  %v1469_v51 = vpack.c.bf16 %v1042_v39, %v1042_v39  ;;  %v972_v53 = vmul.f32 %v1806_v2, %v933_v45  ;;  %v918_v56 = vld [vmem:[#allocation2 + $0x18] sm:$0xff]  ;;  %v370_v39 = vld [vmem:[#allocation2 + $0xc0] sm:$0xff] }
 0x117   : > { %v934_v57 = vld [vmem:[#allocation2 + $0x98] sm:$0xff]  ;;  %884 = vst.msk [vmem:[#allocation2 + $0x20] sm:$0xff] %vm313_vm0, %v851_v46  ;;  %900 = vst.msk [vmem:[#allocation2 + $0xa0] sm:$0xff] %vm313_vm0, %v867_v47  ;;  %v995_v60 = vadd.f32 %v1811_v12, %v956_v52  ;;  %v957_v62 = vmul.f32 %v1806_v2, %v918_v56  ;;  %v355_v46 = vld [vmem:[#allocation2 + $0x48] sm:$0xff] }
 0x118   : > { %1187 = vst.msk [vmem:[%s1829_s28 + $0x4] sm:$0xf] %vm1185_vm4, %v1453_v50  ;;  %1203 = vst.msk [vmem:[%s1829_s28 + $0x44] sm:$0xf] %vm1185_vm4, %v1469_v51  ;;  %v1011_v61 = vadd.f32 %v1811_v12, %v972_v53  ;;  %v973_v63 = vmul.f32 %v1806_v2, %v934_v57  ;;  %v371_v47 = vld [vmem:[#allocation2 + $0xc8] sm:$0xff] }
 0x119   : > { %885 = vst.msk [vmem:[#allocation2 + $0x28] sm:$0xff] %vm313_vm0, %v852_v58  ;;  %901 = vst.msk [vmem:[#allocation2 + $0xa8] sm:$0xff] %vm313_vm0, %v868_v59  ;;  %v1027_v0 = vmax.f32 %v995_v60, 0.0  ;;  %v996_v3 = vadd.f32 %v1811_v12, %v957_v62 }
 0x11a   : > { %v1043_v1 = vmax.f32 %v1011_v61, 0.0  ;;  %v1012_v4 = vadd.f32 %v1811_v12, %v973_v63  ;;  %v744_v7 = vpop.f32.mrb[12].mxu0  ;;  %v808_v8 = vpop.f32.mrb[12].mxu1 }
 0x11b   : > { %v1454_v11 = vpack.c.bf16 %v1027_v0, %v1027_v0  ;;  %v1028_v14 = vmax.f32 %v996_v3, 0.0  ;;  %v746_v16 = vpop.f32.mrb[13].mxu0  ;;  %v810_v17 = vpop.f32.mrb[13].mxu1  ;;  %v853_v18 = vadd.f32 %v744_v7, %v352_v5  ;;  %v869_v19 = vadd.f32 %v808_v8, %v368_v6 }
 0x11c   : > { %v1470_v13 = vpack.c.bf16 %v1043_v1, %v1043_v1  ;;  %v1044_v15 = vmax.f32 %v1012_v4, 0.0  ;;  %v747_v20 = vpop.f32.mrb[14].mxu0  ;;  %v811_v21 = vpop.f32.mrb[14].mxu1 }
 0x11d   : > { %1188 = vst.msk [vmem:[%s1829_s28 + $0x8] sm:$0xf] %vm1185_vm4, %v1454_v11  ;;  %v1455_v22 = vpack.c.bf16 %v1028_v14, %v1028_v14  ;;  %v854_v26 = vadd.f32 %v747_v20, %v353_v9  ;;  %v870_v27 = vadd.f32 %v811_v21, %v369_v10  ;;  %v749_v28 = vpop.f32.mrb[15].mxu0  ;;  %v813_v29 = vpop.f32.mrb[15].mxu1  ;;  %v356_v11 = vld [vmem:[#allocation2 + $0x50] sm:$0xff] }
 0x11e   : > { %1204 = vst.msk [vmem:[%s1829_s28 + $0x48] sm:$0xf] %vm1185_vm4, %v1470_v13  ;;  %v1471_v23 = vpack.c.bf16 %v1044_v15, %v1044_v15  ;;  %v919_v24 = vld [vmem:[#allocation2 + $0x20] sm:$0xff]  ;;  %v372_v13 = vld [vmem:[#allocation2 + $0xd0] sm:$0xff] }
 0x11f   : > { %v935_v25 = vld [vmem:[#allocation2 + $0xa0] sm:$0xff]  ;;  %v958_v30 = vmul.f32 %v1806_v2, %v919_v24  ;;  %886 = vst.msk [vmem:[#allocation2 + $0x30] sm:$0xff] %vm313_vm0, %v853_v18  ;;  %902 = vst.msk [vmem:[#allocation2 + $0xb0] sm:$0xff] %vm313_vm0, %v869_v19 }
 0x120   : > { %v974_v31 = vmul.f32 %v1806_v2, %v935_v25  ;;  %1189 = vst.msk [vmem:[%s1829_s28 + $0xc] sm:$0xf] %vm1185_vm4, %v1455_v22  ;;  %1205 = vst.msk [vmem:[%s1829_s28 + $0x4c] sm:$0xf] %vm1185_vm4, %v1471_v23  ;;  %v920_v32 = vld [vmem:[#allocation2 + $0x28] sm:$0xff] }
 0x121   : > { %v936_v33 = vld [vmem:[#allocation2 + $0xa8] sm:$0xff]  ;;  %887 = vst.msk [vmem:[#allocation2 + $0x38] sm:$0xff] %vm313_vm0, %v854_v26  ;;  %903 = vst.msk [vmem:[#allocation2 + $0xb8] sm:$0xff] %vm313_vm0, %v870_v27  ;;  %v997_v34 = vadd.f32 %v1811_v12, %v958_v30  ;;  %v959_v36 = vmul.f32 %v1806_v2, %v920_v32  ;;  %v357_v26 = vld [vmem:[#allocation2 + $0x58] sm:$0xff] }
 0x122   : > { %v1013_v35 = vadd.f32 %v1811_v12, %v974_v31  ;;  %v975_v37 = vmul.f32 %v1806_v2, %v936_v33  ;;  %v752_v44 = vpop.f32.mrb[16].mxu0  ;;  %v816_v45 = vpop.f32.mrb[16].mxu1  ;;  %v373_v27 = vld [vmem:[#allocation2 + $0xd8] sm:$0xff] }
 0x123   : > { %v1029_v40 = vmax.f32 %v997_v34, 0.0  ;;  %v998_v42 = vadd.f32 %v1811_v12, %v959_v36  ;;  %v855_v48 = vadd.f32 %v752_v44, %v354_v38  ;;  %v871_v49 = vadd.f32 %v816_v45, %v370_v39  ;;  %v754_v50 = vpop.f32.mrb[17].mxu0  ;;  %v818_v51 = vpop.f32.mrb[17].mxu1 }
 0x124   : > { %v1045_v41 = vmax.f32 %v1013_v35, 0.0  ;;  %v1014_v43 = vadd.f32 %v1811_v12, %v975_v37  ;;  %v755_v56 = vpop.f32.mrb[18].mxu0  ;;  %v819_v57 = vpop.f32.mrb[18].mxu1 }
 0x125   : > { %v1456_v52 = vpack.c.bf16 %v1029_v40, %v1029_v40  ;;  %v1030_v54 = vmax.f32 %v998_v42, 0.0  ;;  %888 = vst.msk [vmem:[#allocation2 + $0x40] sm:$0xff] %vm313_vm0, %v855_v48  ;;  %904 = vst.msk [vmem:[#allocation2 + $0xc0] sm:$0xff] %vm313_vm0, %v871_v49  ;;  %v856_v60 = vadd.f32 %v755_v56, %v355_v46  ;;  %v872_v61 = vadd.f32 %v819_v57, %v371_v47  ;;  %v757_v62 = vpop.f32.mrb[19].mxu0  ;;  %v821_v63 = vpop.f32.mrb[19].mxu1 }
 0x126   : > { %v1472_v53 = vpack.c.bf16 %v1045_v41, %v1045_v41  ;;  %v1046_v55 = vmax.f32 %v1014_v43, 0.0  ;;  %v921_v58 = vld [vmem:[#allocation2 + $0x30] sm:$0xff]  ;;  %v359_v62 = vld [vmem:[#allocation2 + $0x68] sm:$0xff] }
 0x127   : > { %v937_v59 = vld [vmem:[#allocation2 + $0xb0] sm:$0xff]  ;;  %1190 = vst.msk [vmem:[%s1829_s28 + $0x10] sm:$0xf] %vm1185_vm4, %v1456_v52  ;;  %v1457_v0 = vpack.c.bf16 %v1030_v54, %v1030_v54  ;;  %v960_v3 = vmul.f32 %v1806_v2, %v921_v58  ;;  %v358_v52 = vld [vmem:[#allocation2 + $0x60] sm:$0xff]  ;;  %v375_v63 = vld [vmem:[#allocation2 + $0xe8] sm:$0xff] }
 0x128   : > { %1206 = vst.msk [vmem:[%s1829_s28 + $0x50] sm:$0xf] %vm1185_vm4, %v1472_v53  ;;  %v1473_v1 = vpack.c.bf16 %v1046_v55, %v1046_v55  ;;  %v976_v4 = vmul.f32 %v1806_v2, %v937_v59  ;;  %v922_v5 = vld [vmem:[#allocation2 + $0x38] sm:$0xff]  ;;  %v374_v53 = vld [vmem:[#allocation2 + $0xe0] sm:$0xff] }
 0x129   : > { %v938_v6 = vld [vmem:[#allocation2 + $0xb8] sm:$0xff]  ;;  %v961_v7 = vmul.f32 %v1806_v2, %v922_v5  ;;  %889 = vst.msk [vmem:[#allocation2 + $0x48] sm:$0xff] %vm313_vm0, %v856_v60  ;;  %905 = vst.msk [vmem:[#allocation2 + $0xc8] sm:$0xff] %vm313_vm0, %v872_v61  ;;  %v999_v9 = vadd.f32 %v1811_v12, %v960_v3 }
 0x12a   : > { %v977_v8 = vmul.f32 %v1806_v2, %v938_v6  ;;  %1191 = vst.msk [vmem:[%s1829_s28 + $0x14] sm:$0xf] %vm1185_vm4, %v1457_v0  ;;  %1207 = vst.msk [vmem:[%s1829_s28 + $0x54] sm:$0xf] %vm1185_vm4, %v1473_v1  ;;  %v1015_v10 = vadd.f32 %v1811_v12, %v976_v4  ;;  %v760_v18 = vpop.f32.mrb[20].mxu0  ;;  %v824_v19 = vpop.f32.mrb[20].mxu1 }
 0x12b   : > { %v1000_v14 = vadd.f32 %v1811_v12, %v961_v7  ;;  %v1031_v16 = vmax.f32 %v999_v9, 0.0  ;;  %v857_v22 = vadd.f32 %v760_v18, %v356_v11  ;;  %v873_v23 = vadd.f32 %v824_v19, %v372_v13  ;;  %v762_v24 = vpop.f32.mrb[21].mxu0  ;;  %v826_v25 = vpop.f32.mrb[21].mxu1 }
 0x12c   : > { %v1016_v15 = vadd.f32 %v1811_v12, %v977_v8  ;;  %v1047_v17 = vmax.f32 %v1015_v10, 0.0  ;;  %v923_v30 = vld [vmem:[#allocation2 + $0x40] sm:$0xff]  ;;  %v763_v32 = vpop.f32.mrb[22].mxu0  ;;  %v827_v33 = vpop.f32.mrb[22].mxu1 }
 0x12d   : > { %v1032_v20 = vmax.f32 %v1000_v14, 0.0  ;;  %v1458_v28 = vpack.c.bf16 %v1031_v16, %v1031_v16  ;;  %v939_v31 = vld [vmem:[#allocation2 + $0xc0] sm:$0xff]  ;;  %v962_v36 = vmul.f32 %v1806_v2, %v923_v30  ;;  %890 = vst.msk [vmem:[#allocation2 + $0x50] sm:$0xff] %vm313_vm0, %v857_v22  ;;  %906 = vst.msk [vmem:[#allocation2 + $0xd0] sm:$0xff] %vm313_vm0, %v873_v23  ;;  %v765_v38 = vpop.f32.mrb[23].mxu0  ;;  %v829_v39 = vpop.f32.mrb[23].mxu1  ;;  %v858_v42 = vadd.f32 %v763_v32, %v357_v26 }
 0x12e   : > { %v1048_v21 = vmax.f32 %v1016_v15, 0.0  ;;  %v1474_v29 = vpack.c.bf16 %v1047_v17, %v1047_v17  ;;  %v978_v37 = vmul.f32 %v1806_v2, %v939_v31  ;;  %v874_v43 = vadd.f32 %v827_v33, %v373_v27  ;;  %v360_v22 = vld [vmem:[#allocation2 + $0x70] sm:$0xff]  ;;  %v361_v30 = vld [vmem:[#allocation2 + $0x78] sm:$0xff] }
 0x12f   : > { %v1459_v34 = vpack.c.bf16 %v1032_v20, %v1032_v20  ;;  %1192 = vst.msk [vmem:[%s1829_s28 + $0x18] sm:$0xf] %vm1185_vm4, %v1458_v28  ;;  %v1001_v44 = vadd.f32 %v1811_v12, %v962_v36  ;;  %v376_v23 = vld [vmem:[#allocation2 + $0xf0] sm:$0xff]  ;;  %v377_v31 = vld [vmem:[#allocation2 + $0xf8] sm:$0xff] }
 0x130   : > { %v1475_v35 = vpack.c.bf16 %v1048_v21, %v1048_v21  ;;  %1208 = vst.msk [vmem:[%s1829_s28 + $0x58] sm:$0xf] %vm1185_vm4, %v1474_v29  ;;  %v924_v40 = vld [vmem:[#allocation2 + $0x48] sm:$0xff]  ;;  %v1017_v45 = vadd.f32 %v1811_v12, %v978_v37 }
 0x131   : > { %v940_v41 = vld [vmem:[#allocation2 + $0xc8] sm:$0xff]  ;;  %1193 = vst.msk [vmem:[%s1829_s28 + $0x1c] sm:$0xf] %vm1185_vm4, %v1459_v34  ;;  %v963_v46 = vmul.f32 %v1806_v2, %v924_v40  ;;  %v1033_v48 = vmax.f32 %v1001_v44, 0.0 }
 0x132   : > { %1209 = vst.msk [vmem:[%s1829_s28 + $0x5c] sm:$0xf] %vm1185_vm4, %v1475_v35  ;;  %v979_v47 = vmul.f32 %v1806_v2, %v940_v41  ;;  %v1049_v49 = vmax.f32 %v1017_v45, 0.0  ;;  %v768_v54 = vpop.f32.mrb[24].mxu0  ;;  %v832_v55 = vpop.f32.mrb[24].mxu1 }
 0x133   : > { %891 = vst.msk [vmem:[#allocation2 + $0x58] sm:$0xff] %vm313_vm0, %v858_v42  ;;  %907 = vst.msk [vmem:[#allocation2 + $0xd8] sm:$0xff] %vm313_vm0, %v874_v43  ;;  %v1002_v50 = vadd.f32 %v1811_v12, %v963_v46  ;;  %v1460_v56 = vpack.c.bf16 %v1033_v48, %v1033_v48  ;;  %v770_v60 = vpop.f32.mrb[25].mxu0  ;;  %v834_v61 = vpop.f32.mrb[25].mxu1  ;;  %v859_v3 = vadd.f32 %v768_v54, %v358_v52 }
 0x134   : > { %v1018_v51 = vadd.f32 %v1811_v12, %v979_v47  ;;  %v1476_v57 = vpack.c.bf16 %v1049_v49, %v1049_v49  ;;  %v925_v0 = vld [vmem:[#allocation2 + $0x50] sm:$0xff]  ;;  %v875_v4 = vadd.f32 %v832_v55, %v374_v53  ;;  %v771_v5 = vpop.f32.mrb[26].mxu0  ;;  %v835_v6 = vpop.f32.mrb[26].mxu1 }
 0x135   : > { %v1034_v58 = vmax.f32 %v1002_v50, 0.0  ;;  %v941_v1 = vld [vmem:[#allocation2 + $0xd0] sm:$0xff]  ;;  %1194 = vst.msk [vmem:[%s1829_s28 + $0x20] sm:$0xf] %vm1185_vm4, %v1460_v56  ;;  %v964_v9 = vmul.f32 %v1806_v2, %v925_v0  ;;  %v773_v11 = vpop.f32.mrb[27].mxu0  ;;  %v837_v13 = vpop.f32.mrb[27].mxu1  ;;  %v860_v14 = vadd.f32 %v771_v5, %v359_v62  ;;  %v876_v15 = vadd.f32 %v835_v6, %v375_v63 }
 0x136   : > { %v1050_v59 = vmax.f32 %v1018_v51, 0.0  ;;  %1210 = vst.msk [vmem:[%s1829_s28 + $0x60] sm:$0xf] %vm1185_vm4, %v1476_v57  ;;  %v980_v10 = vmul.f32 %v1806_v2, %v941_v1 }
 0x137   : > { %v1461_v7 = vpack.c.bf16 %v1034_v58, %v1034_v58  ;;  %892 = vst.msk [vmem:[#allocation2 + $0x60] sm:$0xff] %vm313_vm0, %v859_v3  ;;  %908 = vst.msk [vmem:[#allocation2 + $0xe0] sm:$0xff] %vm313_vm0, %v875_v4  ;;  %v1003_v16 = vadd.f32 %v1811_v12, %v964_v9 }
 0x138   : > { %v1477_v8 = vpack.c.bf16 %v1050_v59, %v1050_v59  ;;  %v1019_v17 = vadd.f32 %v1811_v12, %v980_v10  ;;  %893 = vst.msk [vmem:[#allocation2 + $0x68] sm:$0xff] %vm313_vm0, %v860_v14  ;;  %909 = vst.msk [vmem:[#allocation2 + $0xe8] sm:$0xff] %vm313_vm0, %v876_v15 }
 0x139   : > { %1195 = vst.msk [vmem:[%s1829_s28 + $0x24] sm:$0xf] %vm1185_vm4, %v1461_v7  ;;  %v1035_v24 = vmax.f32 %v1003_v16, 0.0 }
 0x13a   : > { %1211 = vst.msk [vmem:[%s1829_s28 + $0x64] sm:$0xf] %vm1185_vm4, %v1477_v8  ;;  %v926_v18 = vld [vmem:[#allocation2 + $0x58] sm:$0xff]  ;;  %v1051_v25 = vmax.f32 %v1019_v17, 0.0  ;;  %v776_v28 = vpop.f32.mrb[28].mxu0  ;;  %v840_v29 = vpop.f32.mrb[28].mxu1 }
 0x13b   : > { %v942_v19 = vld [vmem:[#allocation2 + $0xd8] sm:$0xff]  ;;  %v965_v20 = vmul.f32 %v1806_v2, %v926_v18  ;;  %v1462_v32 = vpack.c.bf16 %v1035_v24, %v1035_v24  ;;  %v861_v34 = vadd.f32 %v776_v28, %v360_v22  ;;  %v877_v35 = vadd.f32 %v840_v29, %v376_v23  ;;  %v778_v36 = vpop.f32.mrb[29].mxu0  ;;  %v842_v37 = vpop.f32.mrb[29].mxu1 }
 0x13c   : > { %v981_v21 = vmul.f32 %v1806_v2, %v942_v19  ;;  %v1478_v33 = vpack.c.bf16 %v1051_v25, %v1051_v25  ;;  %v779_v40 = vpop.f32.mrb[30].mxu0  ;;  %v843_v41 = vpop.f32.mrb[30].mxu1 }
 0x13d   : > { %v1004_v26 = vadd.f32 %v1811_v12, %v965_v20  ;;  %1196 = vst.msk [vmem:[%s1829_s28 + $0x28] sm:$0xf] %vm1185_vm4, %v1462_v32  ;;  %v862_v44 = vadd.f32 %v779_v40, %v361_v30  ;;  %v878_v45 = vadd.f32 %v843_v41, %v377_v31  ;;  %v781_v46 = vpop.f32.mrb[31].mxu0  ;;  %v845_v47 = vpop.f32.mrb[31].mxu1 }
 0x13e   : > { %v1020_v27 = vadd.f32 %v1811_v12, %v981_v21  ;;  %1212 = vst.msk [vmem:[%s1829_s28 + $0x68] sm:$0xf] %vm1185_vm4, %v1478_v33  ;;  %v927_v42 = vld [vmem:[#allocation2 + $0x60] sm:$0xff] }
 0x13f   : > { %v1036_v38 = vmax.f32 %v1004_v26, 0.0  ;;  %v943_v43 = vld [vmem:[#allocation2 + $0xe0] sm:$0xff]  ;;  %894 = vst.msk [vmem:[#allocation2 + $0x70] sm:$0xff] %vm313_vm0, %v861_v34  ;;  %910 = vst.msk [vmem:[#allocation2 + $0xf0] sm:$0xff] %vm313_vm0, %v877_v35  ;;  %v966_v50 = vmul.f32 %v1806_v2, %v927_v42  ;;  %v928_v52 = vld [vmem:[#allocation2 + $0x68] sm:$0xff] }
 0x140   : > { %v1052_v39 = vmax.f32 %v1020_v27, 0.0  ;;  %v982_v51 = vmul.f32 %v1806_v2, %v943_v43  ;;  %v944_v53 = vld [vmem:[#allocation2 + $0xe8] sm:$0xff]  ;;  %895 = vst.msk [vmem:[#allocation2 + $0x78] sm:$0xff] %vm313_vm0, %v862_v44  ;;  %911 = vst.msk [vmem:[#allocation2 + $0xf8] sm:$0xff] %vm313_vm0, %v878_v45  ;;  %v967_v56 = vmul.f32 %v1806_v2, %v928_v52 }
 0x141   : > { %v1463_v48 = vpack.c.bf16 %v1036_v38, %v1036_v38  ;;  %v1005_v54 = vadd.f32 %v1811_v12, %v966_v50  ;;  %v983_v57 = vmul.f32 %v1806_v2, %v944_v53 }
 0x142   : > { %v1479_v49 = vpack.c.bf16 %v1052_v39, %v1052_v39  ;;  %v1021_v55 = vadd.f32 %v1811_v12, %v982_v51  ;;  %v1006_v60 = vadd.f32 %v1811_v12, %v967_v56 }
 0x143   : > { %1197 = vst.msk [vmem:[%s1829_s28 + $0x2c] sm:$0xf] %vm1185_vm4, %v1463_v48  ;;  %v1037_v58 = vmax.f32 %v1005_v54, 0.0  ;;  %v1022_v61 = vadd.f32 %v1811_v12, %v983_v57 }
 0x144   : > { %1213 = vst.msk [vmem:[%s1829_s28 + $0x6c] sm:$0xf] %vm1185_vm4, %v1479_v49  ;;  %v1053_v59 = vmax.f32 %v1021_v55, 0.0  ;;  %v1038_v0 = vmax.f32 %v1006_v60, 0.0 }
 0x145   : > { %v1464_v62 = vpack.c.bf16 %v1037_v58, %v1037_v58  ;;  %v1054_v1 = vmax.f32 %v1022_v61, 0.0 }
 0x146   : > { %v1480_v63 = vpack.c.bf16 %v1053_v59, %v1053_v59  ;;  %v929_v3 = vld [vmem:[#allocation2 + $0x70] sm:$0xff]  ;;  %v1465_v7 = vpack.c.bf16 %v1038_v0, %v1038_v0 }
 0x147   : > { %v945_v4 = vld [vmem:[#allocation2 + $0xf0] sm:$0xff]  ;;  %v968_v5 = vmul.f32 %v1806_v2, %v929_v3  ;;  %1198 = vst.msk [vmem:[%s1829_s28 + $0x30] sm:$0xf] %vm1185_vm4, %v1464_v62  ;;  %v1481_v8 = vpack.c.bf16 %v1054_v1, %v1054_v1  ;;  %v930_v9 = vld [vmem:[#allocation2 + $0x78] sm:$0xff] }
 0x148   : > { %v984_v6 = vmul.f32 %v1806_v2, %v945_v4  ;;  %1214 = vst.msk [vmem:[%s1829_s28 + $0x70] sm:$0xf] %vm1185_vm4, %v1480_v63  ;;  %v946_v10 = vld [vmem:[#allocation2 + $0xf8] sm:$0xff]  ;;  %v969_v14 = vmul.f32 %v1806_v2, %v930_v9  ;;  %1199 = vst.msk [vmem:[%s1829_s28 + $0x34] sm:$0xf] %vm1185_vm4, %v1465_v7 }
 0x149   : > { %v1007_v11 = vadd.f32 %v1811_v12, %v968_v5  ;;  %v985_v15 = vmul.f32 %v1806_v2, %v946_v10  ;;  %1215 = vst.msk [vmem:[%s1829_s28 + $0x74] sm:$0xf] %vm1185_vm4, %v1481_v8 }
 0x14a   : > { %v1023_v13 = vadd.f32 %v1811_v12, %v984_v6  ;;  %v1008_v18 = vadd.f32 %v1811_v12, %v969_v14 }
 0x14b   : > { %v1039_v16 = vmax.f32 %v1007_v11, 0.0  ;;  %v1024_v19 = vadd.f32 %v1811_v12, %v985_v15 }
 0x14c   : > { %v1055_v17 = vmax.f32 %v1023_v13, 0.0  ;;  %v1040_v22 = vmax.f32 %v1008_v18, 0.0 }
 0x14d   : > { %v1466_v20 = vpack.c.bf16 %v1039_v16, %v1039_v16  ;;  %v1056_v23 = vmax.f32 %v1024_v19, 0.0 }
 0x14e   : > { %v1482_v21 = vpack.c.bf16 %v1055_v17, %v1055_v17  ;;  %v1467_v2 = vpack.c.bf16 %v1040_v22, %v1040_v22 }
 0x14f   : > { %1200 = vst.msk [vmem:[%s1829_s28 + $0x38] sm:$0xf] %vm1185_vm4, %v1466_v20  ;;  %v1483_v24 = vpack.c.bf16 %v1056_v23, %v1056_v23 }
 0x150   : > { %1216 = vst.msk [vmem:[%s1829_s28 + $0x78] sm:$0xf] %vm1185_vm4, %v1482_v21  ;;  %1201 = vst.msk [vmem:[%s1829_s28 + $0x3c] sm:$0xf] %vm1185_vm4, %v1467_v2 }
 0x151   : > { %1217 = vst.msk [vmem:[%s1829_s28 + $0x7c] sm:$0xf] %vm1185_vm4, %v1483_v24 }
 0x152 PF: > { %s14_s17 = sadd.s32 1, %s1611_s17   ;;  %s1989_s15 = smov %s1607_s16 }
 0x153   : > { %p11_p5 = scmp.ge.s32.totalorder %s14_s17, 10   ;;  %s1990_s16 = smov %s1992_s18 }
 0x155   :  { %13 = sbr.rel (!%p11_p5) target bundleno = 2 (0x2), region = 83 }

</bundles_post_ra>
